<compile_context>
chip_gen: v6e
topology: v6e:2x2x1
jax: 0.10.0
libtpu: 0.0.40
codegen_flags: <defaults>
</compile_context>

<pallas_src>
import functools
import math

import jax
import jax.numpy as jnp
from jax.experimental import pallas as pl
from jax.experimental.pallas import tpu as pltpu

_LANES = 128


def _chip_config():
    """Generation-aware tiling defaults (safe fallback if detection fails)."""
    kind = ""
    try:
        kind = jax.devices()[0].device_kind.lower()
    except Exception:
        pass
    if "v7" in kind:   # 2 TensorCores, ~3.2 TB/s HBM, 64 MiB VMEM per TC
        return dict(max_tile_rows=4096, core_splits=2, input_buffers=3,
                    default_scoped_vmem=32 << 20, physical_vmem=64 << 20)
    if "v6" in kind:   # 1 TC, 128 MiB VMEM, 32 MiB default scoped
        return dict(max_tile_rows=4096, core_splits=1, input_buffers=2,
                    default_scoped_vmem=32 << 20, physical_vmem=128 << 20)
    if "v5" in kind:   # 1 TC, 16 MiB default scoped
        return dict(max_tile_rows=2048, core_splits=1, input_buffers=2,
                    default_scoped_vmem=16 << 20, physical_vmem=128 << 20)
    # unknown / older generation: conservative defaults that work everywhere
    return dict(max_tile_rows=2048, core_splits=1, input_buffers=2,
                default_scoped_vmem=16 << 20, physical_vmem=64 << 20)


def _margin_mse_kernel(sp_ref, sn_ref, lp_ref, ln_ref, out_ref, acc_ref, *,
                       n_true, n_blocks, needs_mask):
    c = pl.program_id(0)      # core-split axis ("parallel")
    j = pl.program_id(1)      # reduction axis ("arbitrary", resident acc)
    n_j = pl.num_programs(1)

    @pl.when(j == 0)
    def _():
        acc_ref[...] = jnp.zeros_like(acc_ref)

    # elementwise squared margin difference on this tile (cast in-kernel)
    d = (sp_ref[...].astype(jnp.float32) - sn_ref[...].astype(jnp.float32)) - (
        lp_ref[...].astype(jnp.float32) - ln_ref[...].astype(jnp.float32))
    sq = d * d

    tr, tl = sp_ref.shape
    acc_rows = acc_ref.shape[0]

    def _accumulate(x):
        # Fold the tile into the (acc_rows, 128) accumulator: pure VPU adds,
        # no per-step cross-lane reduce, no tile-sized acc load/store.
        if tr != acc_rows:
            x = x.reshape(tr // acc_rows, acc_rows, tl).sum(axis=0)
        acc_ref[...] += x

    if needs_mask:
        block_idx = c * n_j + j   # logical block index (matches the index_map)

        # Only the last logical block can be ragged; clamped (duplicated)
        # blocks on the second core split also land here.  Everything before
        # it is fully valid and takes the unmasked fast path.
        @pl.when(block_idx < n_blocks - 1)
        def _():
            _accumulate(sq)

        @pl.when(block_idx >= n_blocks - 1)
        def _():
            row = jax.lax.broadcasted_iota(jnp.int32, (tr, tl), 0)
            col = jax.lax.broadcasted_iota(jnp.int32, (tr, tl), 1)
            flat_idx = block_idx * (tr * tl) + row * tl + col
            _accumulate(jnp.where(flat_idx < n_true, sq, 0.0))
    else:
        _accumulate(sq)

    @pl.when(j == n_j - 1)
    def _():
        out_ref[0, 0] = jnp.sum(acc_ref[...])   # one cross-lane reduce per core


def margin_mse_loss(scores_pos, scores_neg, label_pos, label_neg, *,
                    max_tile_rows=None, num_core_splits=None):
    assert (scores_pos.shape == scores_neg.shape
            == label_pos.shape == label_neg.shape)

    n_true = math.prod(scores_pos.shape)
    assert n_true > 0

    cfg = _chip_config()
    if max_tile_rows is None:
        max_tile_rows = cfg["max_tile_rows"]
    if num_core_splits is None:
        num_core_splits = cfg["core_splits"]

    # Pad only to a 128-lane multiple (needed for the (rows, 128) reshape).
    # Padded zeros contribute 0 to the sum, so they never need masking.
    n_pad = ((n_true + _LANES - 1) // _LANES) * _LANES

    def _prep(x):
        flat = jnp.ravel(x)                    # native dtype; cast in-kernel
        if n_pad != n_true:
            flat = jnp.pad(flat, (0, n_pad - n_true))
        return flat.reshape(n_pad // _LANES, _LANES)

    sp, sn, lp, ln = (_prep(x) for x in
                      (scores_pos, scores_neg, label_pos, label_neg))

    rows = n_pad // _LANES
    # A whole-array block is always legal; otherwise the tile row count is a
    # multiple of 8, satisfying the (8, 128) block_shape constraint.
    tile_rows = rows if rows <= max_tile_rows else max_tile_rows
    n_blocks = pl.cdiv(rows, tile_rows)

    # Collapse the core split on single-TC chips / tiny inputs.
    core_splits = max(1, min(num_core_splits, n_blocks))
    steps_per_core = pl.cdiv(n_blocks, core_splits)
    grid = (core_splits, steps_per_core)

    # Mask only needed when the grid covers more rows than actually exist
    # (partial last block and/or clamped duplicate blocks on the 2nd core).
    needs_mask = (core_splits * steps_per_core * tile_rows) != rows

    if core_splits * steps_per_core == n_blocks:
        def in_map(c, j):
            return (c * steps_per_core + j, 0)
    else:
        def in_map(c, j):
            return (jnp.minimum(c * steps_per_core + j, n_blocks - 1), 0)

    # Per-step accumulator collapses to a single (8, 128) slab when possible.
    acc_rows = 8 if tile_rows % 8 == 0 else tile_rows

    block_kwargs = {}
    if cfg["input_buffers"] > 2 and steps_per_core > 2:
        # Deeper input pipelining on v7x (fast HBM; DMAs finish early).
        block_kwargs["pipeline_mode"] = pl.Buffered(cfg["input_buffers"])
    in_spec = pl.BlockSpec((tile_rows, _LANES), in_map, **block_kwargs)

    # Raise the scoped-VMEM limit only when the pipelined footprint needs it.
    in_bytes_per_step = sum(tile_rows * _LANES * jnp.dtype(x.dtype).itemsize
                            for x in (sp, sn, lp, ln))
    n_bufs = cfg["input_buffers"] if "pipeline_mode" in block_kwargs else 2
    footprint = n_bufs * in_bytes_per_step + acc_rows * _LANES * 4
    compiler_kwargs = dict(dimension_semantics=("parallel", "arbitrary"))
    if footprint + (2 << 20) > cfg["default_scoped_vmem"]:
        compiler_kwargs["vmem_limit_bytes"] = int(
            min(footprint + (4 << 20), cfg["physical_vmem"] - (2 << 20)))

    kernel = functools.partial(_margin_mse_kernel, n_true=n_true,
                               n_blocks=n_blocks, needs_mask=needs_mask)

    cost = pl.CostEstimate(
        flops=6 * n_true,
        transcendentals=0,
        bytes_accessed=sum(int(x.size) * jnp.dtype(x.dtype).itemsize
                           for x in (sp, sn, lp, ln)) + 4 * core_splits)

    partials = pl.pallas_call(
        kernel,
        out_shape=jax.ShapeDtypeStruct((core_splits, 1), jnp.float32),
        grid_spec=pltpu.PrefetchScalarGridSpec(
            num_scalar_prefetch=0,
            grid=grid,
            in_specs=[in_spec, in_spec, in_spec, in_spec],
            out_specs=pl.BlockSpec((1, 1), lambda c, j: (c, 0),
                                   memory_space=pltpu.SMEM),
            scratch_shapes=[pltpu.VMEM((acc_rows, _LANES), jnp.float32)],
        ),
        compiler_params=pltpu.CompilerParams(**compiler_kwargs),
        cost_estimate=cost,
    )(sp, sn, lp, ln)

    # Combine per-core partial sums and apply 1/N (trace-time constant).
    return jnp.sum(partials) * (1.0 / float(n_true))


if __name__ == "__main__":
    key = jax.random.PRNGKey(0)
    k1, k2, k3, k4 = jax.random.split(key, 4)

    def _ref(a, b, c, d):
        f = lambda x: x.astype(jnp.float32)
        return jnp.mean(jnp.square(f(a) - f(b) - (f(c) - f(d))))

    # main demo: (batch, seq) scores, f32, lane-aligned single-tile fast path
    shape = (4, 512)
    sp = jax.random.normal(k1, shape, dtype=jnp.float32)
    sn = jax.random.normal(k2, shape, dtype=jnp.float32)
    lp = jax.random.normal(k3, shape, dtype=jnp.float32)
    ln = jax.random.normal(k4, shape, dtype=jnp.float32)
    loss = margin_mse_loss(sp, sn, lp, ln)
    jax.block_until_ready(loss)
    assert jnp.allclose(loss, _ref(sp, sn, lp, ln), rtol=1e-5, atol=1e-6), loss

    # ragged, non-128-multiple element count (wrapper pad path, no mask)
    shape2 = (3, 100)
    sp2 = jax.random.normal(k1, shape2, dtype=jnp.float32)
    sn2 = jax.random.normal(k2, shape2, dtype=jnp.float32)
    lp2 = jax.random.normal(k3, shape2, dtype=jnp.float32)
    ln2 = jax.random.normal(k4, shape2, dtype=jnp.float32)
    loss2 = margin_mse_loss(sp2, sn2, lp2, ln2)
    jax.block_until_ready(loss2)
    assert jnp.allclose(loss2, _ref(sp2, sn2, lp2, ln2),
                        rtol=1e-5, atol=1e-6), loss2

    # bf16 inputs (native-dtype streaming, f32 accumulate in-kernel)
    sp3, sn3, lp3, ln3 = (x.astype(jnp.bfloat16) for x in (sp, sn, lp, ln))
    loss3 = margin_mse_loss(sp3, sn3, lp3, ln3)
    jax.block_until_ready(loss3)
    assert jnp.allclose(loss3, _ref(sp3, sn3, lp3, ln3),
                        rtol=1e-4, atol=1e-5), loss3

    # multi-block + ragged tail + 2-way core split (forced tiny tiles so the
    # partial-last-block mask and the clamped duplicate block are exercised).
    n4 = 2600
    sp4 = jax.random.normal(k1, (n4,), dtype=jnp.float32)
    sn4 = jax.random.normal(k2, (n4,), dtype=jnp.float32)
    lp4 = jax.random.normal(k3, (n4,), dtype=jnp.float32)
    ln4 = jax.random.normal(k4, (n4,), dtype=jnp.float32)
    loss4 = margin_mse_loss(sp4, sn4, lp4, ln4,
                            max_tile_rows=8, num_core_splits=2)
    jax.block_until_ready(loss4)
    assert jnp.allclose(loss4, _ref(sp4, sn4, lp4, ln4),
                        rtol=1e-5, atol=1e-6), loss4

    print("KERNEL_OK")
</pallas_src>

<mosaic_0001>
module attributes {stable_mosaic.version = 11 : i64} {
  func.func @_margin_mse_kernel(%arg0: i32, %arg1: i32, %arg2: memref<16x128xf32, #tpu.memory_space<vmem>>, %arg3: memref<16x128xf32, #tpu.memory_space<vmem>>, %arg4: memref<16x128xf32, #tpu.memory_space<vmem>>, %arg5: memref<16x128xf32, #tpu.memory_space<vmem>>, %arg6: memref<1x1xf32, #tpu.memory_space<smem>>, %arg7: memref<8x128xf32, #tpu.memory_space<vmem>>) attributes {dimension_semantics = [#tpu.dimension_semantics<parallel>, #tpu.dimension_semantics<arbitrary>], iteration_bounds = array<i64: 1, 1>, scalar_prefetch = 0 : i64, scratch_operands = 1 : i64, tpu.core_type = #tpu.core_type<tc>, window_params = [{transform_indices = @transform_0, window_bounds = array<i64: 16, 128>}, {transform_indices = @transform_1, window_bounds = array<i64: 16, 128>}, {transform_indices = @transform_2, window_bounds = array<i64: 16, 128>}, {transform_indices = @transform_3, window_bounds = array<i64: 16, 128>}, {transform_indices = @transform_4, window_bounds = array<i64: 1, 1>}]} {
    %c0_i32 = arith.constant 0 : i32
    %0 = arith.cmpi eq, %arg1, %c0_i32 : i32
    %1 = arith.extui %0 : i1 to i32
    %c0_i32_0 = arith.constant 0 : i32
    %2 = arith.cmpi ne, %1, %c0_i32_0 : i32
    scf.if %2 {
      %cst_14 = arith.constant 0.000000e+00 : f32
      %19 = vector.broadcast %cst_14 : f32 to vector<8x128xf32>
      %c0_15 = arith.constant 0 : index
      %c0_16 = arith.constant 0 : index
      %20 = vector.load %arg7[%c0_15, %c0_16] : memref<8x128xf32, #tpu.memory_space<vmem>>, vector<8x128xf32>
      tpu.vector_store %arg7[%c0_15, %c0_16], %19 {strides = array<i32>} : memref<8x128xf32, #tpu.memory_space<vmem>>, vector<8x128xf32>,
    } else {
    }
    %c0 = arith.constant 0 : index
    %c0_1 = arith.constant 0 : index
    %3 = vector.load %arg2[%c0, %c0_1] : memref<16x128xf32, #tpu.memory_space<vmem>>, vector<16x128xf32>
    %c0_2 = arith.constant 0 : index
    %c0_3 = arith.constant 0 : index
    %4 = vector.load %arg3[%c0_2, %c0_3] : memref<16x128xf32, #tpu.memory_space<vmem>>, vector<16x128xf32>
    %5 = arith.subf %3, %4 : vector<16x128xf32>
    %c0_4 = arith.constant 0 : index
    %c0_5 = arith.constant 0 : index
    %6 = vector.load %arg4[%c0_4, %c0_5] : memref<16x128xf32, #tpu.memory_space<vmem>>, vector<16x128xf32>
    %c0_6 = arith.constant 0 : index
    %c0_7 = arith.constant 0 : index
    %7 = vector.load %arg5[%c0_6, %c0_7] : memref<16x128xf32, #tpu.memory_space<vmem>>, vector<16x128xf32>
    %8 = arith.subf %6, %7 : vector<16x128xf32>
    %9 = arith.subf %5, %8 : vector<16x128xf32>
    %10 = arith.mulf %9, %9 : vector<16x128xf32>
    %11 = vector.shape_cast %10 : vector<16x128xf32> to vector<2x8x128xf32>
    %cst = arith.constant dense<0.000000e+00> : vector<8x128xf32>
    %12 = vector.multi_reduction <add>, %11, %cst [0] : vector<2x8x128xf32> to vector<8x128xf32>
    %c0_8 = arith.constant 0 : index
    %c0_9 = arith.constant 0 : index
    %13 = vector.load %arg7[%c0_8, %c0_9] : memref<8x128xf32, #tpu.memory_space<vmem>>, vector<8x128xf32>
    %14 = arith.addf %13, %12 : vector<8x128xf32>
    %c0_10 = arith.constant 0 : index
    %c0_11 = arith.constant 0 : index
    %15 = vector.load %arg7[%c0_10, %c0_11] : memref<8x128xf32, #tpu.memory_space<vmem>>, vector<8x128xf32>
    tpu.vector_store %arg7[%c0_10, %c0_11], %14 {strides = array<i32>} : memref<8x128xf32, #tpu.memory_space<vmem>>, vector<8x128xf32>,
    %c0_i32_12 = arith.constant 0 : i32
    %16 = arith.cmpi eq, %arg1, %c0_i32_12 : i32
    %17 = arith.extui %16 : i1 to i32
    %c0_i32_13 = arith.constant 0 : i32
    %18 = arith.cmpi ne, %17, %c0_i32_13 : i32
    scf.if %18 {
      %c0_14 = arith.constant 0 : index
      %c0_15 = arith.constant 0 : index
      %19 = vector.load %arg7[%c0_14, %c0_15] : memref<8x128xf32, #tpu.memory_space<vmem>>, vector<8x128xf32>
      %20 = vector.shape_cast %19 : vector<8x128xf32> to vector<1x8x128xf32>
      %cst_16 = arith.constant dense<0.000000e+00> : vector<1xf32>
      %21 = vector.multi_reduction <add>, %20, %cst_16 [1, 2] : vector<1x8x128xf32> to vector<1xf32>
      %22 = vector.shape_cast %21 : vector<1xf32> to vector<1x1x1xf32>
      %23 = vector.extract %22[0, 0, 0] : f32 from vector<1x1x1xf32>
      %c0_17 = arith.constant 0 : index
      %c0_18 = arith.constant 0 : index
      %24 = memref.load %arg6[%c0_17, %c0_18] : memref<1x1xf32, #tpu.memory_space<smem>>
      memref.store %23, %arg6[%c0_17, %c0_18] : memref<1x1xf32, #tpu.memory_space<smem>>
    } else {
    }
    return
  }
  func.func @transform_0(%arg0: i32, %arg1: i32) -> (i32, i32) {
    %c1_i32 = arith.constant 1 : i32
    %0 = arith.muli %arg0, %c1_i32 : i32
    %1 = arith.addi %0, %arg1 : i32
    %c0_i32 = arith.constant 0 : i32
    %c0_i32_0 = arith.constant 0 : i32
    return %1, %c0_i32 : i32, i32
  }
  func.func @transform_1(%arg0: i32, %arg1: i32) -> (i32, i32) {
    %c1_i32 = arith.constant 1 : i32
    %0 = arith.muli %arg0, %c1_i32 : i32
    %1 = arith.addi %0, %arg1 : i32
    %c0_i32 = arith.constant 0 : i32
    %c0_i32_0 = arith.constant 0 : i32
    return %1, %c0_i32 : i32, i32
  }
  func.func @transform_2(%arg0: i32, %arg1: i32) -> (i32, i32) {
    %c1_i32 = arith.constant 1 : i32
    %0 = arith.muli %arg0, %c1_i32 : i32
    %1 = arith.addi %0, %arg1 : i32
    %c0_i32 = arith.constant 0 : i32
    %c0_i32_0 = arith.constant 0 : i32
    return %1, %c0_i32 : i32, i32
  }
  func.func @transform_3(%arg0: i32, %arg1: i32) -> (i32, i32) {
    %c1_i32 = arith.constant 1 : i32
    %0 = arith.muli %arg0, %c1_i32 : i32
    %1 = arith.addi %0, %arg1 : i32
    %c0_i32 = arith.constant 0 : i32
    %c0_i32_0 = arith.constant 0 : i32
    return %1, %c0_i32 : i32, i32
  }
  func.func @transform_4(%arg0: i32, %arg1: i32) -> (i32, i32) {
    %c0_i32 = arith.constant 0 : i32
    %c0_i32_0 = arith.constant 0 : i32
    return %arg0, %c0_i32 : i32, i32
  }
}

</mosaic_0001>

<bundles_post_ra>
// kernel: tpu_custom_call.1
= control target key start
LH: loop header
LB: loop body
LE: loop exit
PB: predicated region body
PF: predicated region fallthrough
CT: control target
= control target key end

     0   :  { %9 = vsyncpa [#allocation4], 0  ;;  %s317_s0 = inlined_call_operand.hbm [shape: f32[16,128], index: 0, kind: input, shape index: {}]   ;;  %s318_s1 = inlined_call_operand.hbm [shape: f32[16,128], index: 1, kind: input, shape index: {}]   ;;  %s319_s2 = inlined_call_operand.hbm [shape: f32[16,128], index: 2, kind: input, shape index: {}]   ;;  %s320_s3 = inlined_call_operand.hbm [shape: f32[16,128], index: 3, kind: input, shape index: {}]   ;;  %s321_s4 = inlined_call_operand.hbm [shape: f32[1,1], index: 4, kind: output, shape index: {}]  }
   0x1   :  { %10 = vsyncpa [#allocation7], 0 }
   0x2   :  { %11 = vsyncpa [#allocation10], 0 }
   0x3   :  { %12 = vsyncpa [#allocation5], 0  ;;  %s258_s15 = smov [#allocation6]   ;;  %s259_s17 = smov [#allocation3]  }
   0x4   :  { %s38_s16 = sshll.u32 %s258_s15, 4  ;;  %s22_s18 = sshll.u32 %s259_s17, 4  ;;  %s39_s16 = int_to_ptr.vmem [resolvable:$true] %s38_s16  ;;  %s23_s18 = int_to_ptr.vmem [resolvable:$true] %s22_s18 }
   0x5   :  { %s170_s19 = scalar_lea.vmem %s39_s16, 256  ;;  %p175_p1 = scmp.lt.s32.totalorder %s39_s16, %s39_s16 }
   0x6   :  { %p171_p0 = scmp.ne.s32.totalorder %s39_s16, %s170_s19  ;;  %p176_p2 = scmp.lt.s32.totalorder %s170_s19, %s170_s19 }
   0x8   :  { %p177_p3 = por %p176_p2, %p175_p1 }
   0xa   :  { %p178_p4 = pnand %p177_p3, %p171_p0 }
   0xc   :  { %181 = shalt.err (!%p178_p4)
}
   0xd   :  { %s260_s20 = smov 128   ;;  %s261_s21 = smov 8  }
   0xe   :  { %44 = dma.hbm_to_vmem [thread:$0]  %s318_s1, 256, %s39_s16, [#allocation7], %s260_s20, %s260_s20, %s261_s21  }
   0xf   :  { %s190_s24 = scalar_lea.vmem %s23_s18, 256  ;;  %p195_p6 = scmp.lt.s32.totalorder %s23_s18, %s23_s18 }
  0x10   :  { %p191_p5 = scmp.ne.s32.totalorder %s23_s18, %s190_s24  ;;  %p196_p7 = scmp.lt.s32.totalorder %s190_s24, %s190_s24 }
  0x12   :  { %p197_p8 = por %p196_p7, %p195_p6 }
  0x14   :  { %p198_p9 = pnand %p197_p8, %p191_p5 }
  0x16   :  { %201 = shalt.err (!%p198_p9)
}
  0x17   :  { %28 = dma.hbm_to_vmem [thread:$0]  %s317_s0, 256, %s23_s18, [#allocation4], %s260_s20, %s260_s20, %s261_s21  }
  0x18   :  { %s262_s27 = smov [#allocation8]   ;;  %s263_s29 = smov [#allocation9]  }
  0x19   :  { %s54_s28 = sshll.u32 %s262_s27, 4  ;;  %s70_s30 = sshll.u32 %s263_s29, 4  ;;  %s55_s28 = int_to_ptr.vmem [resolvable:$true] %s54_s28  ;;  %s71_s30 = int_to_ptr.vmem [resolvable:$true] %s70_s30 }
  0x1a   :  { %s210_s1 = scalar_lea.vmem %s55_s28, 256  ;;  %p215_p11 = scmp.lt.s32.totalorder %s55_s28, %s55_s28 }
  0x1b   :  { %p211_p10 = scmp.ne.s32.totalorder %s55_s28, %s210_s1  ;;  %p216_p12 = scmp.lt.s32.totalorder %s210_s1, %s210_s1 }
  0x1d   :  { %p217_p13 = por %p216_p12, %p215_p11 }
  0x1f   :  { %p218_p0 = pnand %p217_p13, %p211_p10 }
  0x21   :  { %221 = shalt.err (!%p218_p0)
}
  0x22   :  { %60 = dma.hbm_to_vmem [thread:$0]  %s319_s2, 256, %s55_s28, [#allocation7], %s260_s20, %s260_s20, %s261_s21  }
  0x23   :  { %s230_s0 = scalar_lea.vmem %s71_s30, 256  ;;  %p235_p2 = scmp.lt.s32.totalorder %s71_s30, %s71_s30 }
  0x24   :  { %p231_p1 = scmp.ne.s32.totalorder %s71_s30, %s230_s0  ;;  %p236_p3 = scmp.lt.s32.totalorder %s230_s0, %s230_s0 }
  0x26   :  { %p237_p4 = por %p236_p3, %p235_p2 }
  0x28   :  { %p238_p5 = pnand %p237_p4, %p231_p1 }
  0x2a   :  { %241 = shalt.err (!%p238_p5)
}
  0x2b   :  { %76 = dma.hbm_to_vmem [thread:$0]  %s320_s3, 256, %s71_s30, [#allocation10], %s260_s20, %s260_s20, %s261_s21  }
  0x2c   :  { %250 = dma.done.wait [#allocation4], 256  }
  0x2d   :  { %251 = vsyncadd [#allocation4], 4294967040 }
  0x2e   :  { %252 = dma.done.wait [#allocation7], 512  }
  0x2f   :  { %253 = vsyncadd [#allocation7], 4294966784 }
  0x30   :  { %254 = dma.done.wait [#allocation10], 256  }
  0x31   :  { %255 = vsyncadd [#allocation10], 4294967040  ;;  %v102_v0 = vld [vmem:[#allocation3] sm:$0xff]  ;;  %v103_v1 = vld [vmem:[#allocation3 + $0x8] sm:$0xff]  ;;  %s264_s3 = smov [#allocation11]  }
  0x32   :  { %v104_v2 = vld [vmem:[#allocation6] sm:$0xff]  ;;  %v105_v3 = vld [vmem:[#allocation6 + $0x8] sm:$0xff]  ;;  %v108_v5 = vld [vmem:[#allocation8] sm:$0xff] }
  0x33   :  { %v106_v4 = vsub.f32 %v102_v0, %v104_v2  ;;  %v109_v6 = vld [vmem:[#allocation8 + $0x8] sm:$0xff]  ;;  %v107_v7 = vsub.f32 %v103_v1, %v105_v3  ;;  %v110_v8 = vld [vmem:[#allocation9] sm:$0xff]  ;;  %v111_v9 = vld [vmem:[#allocation9 + $0x8] sm:$0xff] }
  0x34   :  { %v112_v10 = vsub.f32 %v108_v5, %v110_v8  ;;  %v113_v11 = vsub.f32 %v109_v6, %v111_v9 }
  0x36   :  { %v114_v12 = vsub.f32 %v106_v4, %v112_v10  ;;  %v115_v13 = vsub.f32 %v107_v7, %v113_v11 }
  0x38   :  { %v116_v14 = vmul.f32 %v114_v12, %v114_v12  ;;  %v117_v15 = vmul.f32 %v115_v13, %v115_v13 }
  0x3a   :  { %v118_v16 = vadd.f32 %v117_v15, %v116_v14 }
  0x3c   :  { %126 = vadd.xlane.f32.xlu0 %v118_v16 }
  0xc5   :  { %v127_v17 = vpop.xlane.xlu0 %126 }
  0xc6   :  { %v128_v18 = vrot.slane %v127_v17, 4 }
  0xc8   :  { %v129_v19 = vadd.f32 %v128_v18, %v127_v17 }
  0xca   :  { %v130_v20 = vrot.slane %v129_v19, 2 }
  0xcc   :  { %v131_v21 = vadd.f32 %v130_v20, %v129_v19 }
  0xce   :  { %v132_v22 = vrot.slane %v131_v21, 1 }
  0xd0   :  { %v133_v23 = vadd.f32 %v132_v22, %v131_v21 }
  0xd2   :  { %153 = vpush %v133_v23 }
 0x103   :  { %s154_s2 = spop %153 }
 0x104   :  { %136 = sst [smem:[#allocation11]] %s154_s2 }
 0x105   :  { %144 = dma.smem_to_hbm %s264_s3, 16, %s321_s4, [#allocation5]  }
 0x106   :  { %256 = dma.done.wait [#allocation5], 16  }
 0x107   :  { %257 = vsyncadd [#allocation5], 4294967280 }
 0x108   :  { %148 = sfence }
 0x109   :  { %149 = vsyncpa [#allocation4], 1 }
 0x10a   :  { %150 = vsyncpa [#allocation7], 1 }
 0x10b   :  { %151 = vsyncpa [#allocation10], 1 }
 0x10c   :  { %152 = vsyncpa [#allocation5], 1 }

</bundles_post_ra>
